<compile_context>
chip_gen: v7x
topology: tpu7x:2x2x1
jax: 0.10.0
libtpu: 0.0.40
codegen_flags: <defaults>
</compile_context>

<pallas_src>
import jax
import jax.numpy as jnp
from jax.experimental import pallas as pl
from jax.experimental.pallas import tpu as pltpu

TILE_ROWS = 8      # sublanes per batch tile
TILE_LANES = 128   # lanes per batch tile
TILE = TILE_ROWS * TILE_LANES  # 1024 samples per grid step

# Flat parameter layout (17 scalars) consumed by the kernel from SMEM:
#   p[0:3]   = w1[in=0, out=0..2]          (fc1 weights, in_features = 1)
#   p[3:6]   = b1[0..2]
#   p[6:12]  = w2 row-major (in=3, out=2): p[6+2*i+k] = w2[i, k]
#   p[12:14] = b2[0..1]
#   p[14:16] = w3[0..1, out=0]
#   p[16]    = b3[0]


def _mlp_kernel(p_ref, x_ref, o_ref):
    # x_ref: (8, 128) f32 tile in VMEM, batch mapped to sublane x lane.
    # p_ref: (17,) f32 in SMEM, read as scalars and broadcast on the VPU.
    x = x_ref[...]  # (8, 128)

    # fc1 pre-activations stacked to (3, 8, 128), then ONE sigmoid call
    # (one EUP push per full vreg, no per-neuron partial pushes).
    z1 = jnp.stack([p_ref[j] * x + p_ref[3 + j] for j in range(3)], axis=0)
    h1 = jax.nn.sigmoid(z1)  # (3, 8, 128)

    # fc2 pre-activations stacked to (2, 8, 128), then ONE sigmoid call.
    z2 = jnp.stack(
        [
            p_ref[6 + 2 * 0 + k] * h1[0]
            + p_ref[6 + 2 * 1 + k] * h1[1]
            + p_ref[6 + 2 * 2 + k] * h1[2]
            + p_ref[12 + k]
            for k in range(2)
        ],
        axis=0,
    )
    h2 = jax.nn.sigmoid(z2)  # (2, 8, 128)

    # fc3 (no activation) -> full-tile unmasked store.
    o_ref[...] = p_ref[14] * h2[0] + p_ref[15] * h2[1] + p_ref[16]


def _flatten_params(w1, b1, w2, b2, w3, b3):
    """Pack the 17 real scalars in the layout the kernel expects."""
    return jnp.concatenate(
        [
            w1.reshape(-1),  # (3,)   w1 is (1, 3)
            b1.reshape(-1),  # (3,)
            w2.reshape(-1),  # (6,)   row-major (3, 2)
            b2.reshape(-1),  # (2,)
            w3.reshape(-1),  # (2,)   (2, 1)
            b3.reshape(-1),  # (1,)
        ]
    ).astype(jnp.float32)


@jax.jit
def neural_network_forward(x, params_flat):
    """x: (N, 1) float32 -> (N, 1) float32, matching the PyTorch forward."""
    n = x.shape[0]                       # static under jit
    num_tiles = pl.cdiv(n, TILE)         # Python int (static)
    n_pad = num_tiles * TILE

    # Static pad (no dynamic-update-slice), then shape to (num_tiles*8, 128)
    # so each grid step sees one lane-dense (8, 128) batch tile.
    x_tiles = jnp.pad(x[:, 0], (0, n_pad - n)).reshape(
        num_tiles * TILE_ROWS, TILE_LANES
    )

    out_tiles = pl.pallas_call(
        _mlp_kernel,
        out_shape=jax.ShapeDtypeStruct(x_tiles.shape, jnp.float32),
        grid=(num_tiles,),
        in_specs=[
            # 17 scalars, whole array in SMEM (replicated across grid steps).
            pl.BlockSpec(memory_space=pltpu.MemorySpace.SMEM),
            pl.BlockSpec((TILE_ROWS, TILE_LANES), lambda i: (i, 0)),
        ],
        out_specs=pl.BlockSpec((TILE_ROWS, TILE_LANES), lambda i: (i, 0)),
        compiler_params=pltpu.CompilerParams(
            dimension_semantics=("parallel",)  # v7x: shard batch tiles over TCs
        ),
    )(params_flat, x_tiles)

    # Padded lanes/tiles compute finite garbage that is simply never read back.
    return out_tiles.reshape(n_pad)[:n].reshape(n, 1)


def _init_params(key):
    """Deterministic init mirroring nn.Linear's U(-1/sqrt(fan_in), 1/sqrt(fan_in))."""

    def linear(key, fan_in, fan_out):
        kw, kb = jax.random.split(key)
        bound = 1.0 / jnp.sqrt(jnp.float32(fan_in))
        w = jax.random.uniform(kw, (fan_in, fan_out), jnp.float32, -bound, bound)
        b = jax.random.uniform(kb, (fan_out,), jnp.float32, -bound, bound)
        return w, b

    k1, k2, k3 = jax.random.split(key, 3)
    w1, b1 = linear(k1, 1, 3)
    w2, b2 = linear(k2, 3, 2)
    w3, b3 = linear(k3, 2, 1)
    return w1, b1, w2, b2, w3, b3


def _reference_forward(x, w1, b1, w2, b2, w3, b3):
    h = jax.nn.sigmoid(x @ w1 + b1)
    h = jax.nn.sigmoid(h @ w2 + b2)
    return h @ w3 + b3


if __name__ == "__main__":
    key = jax.random.PRNGKey(0)
    params = _init_params(key)
    params_flat = _flatten_params(*params)

    # Same data regime as the PyTorch script: 100 points in [-10, 10], (100, 1).
    x = jnp.linspace(-10.0, 10.0, 100, dtype=jnp.float32).reshape(100, 1)
    out = jax.block_until_ready(neural_network_forward(x, params_flat))
    ref = _reference_forward(x, *params)
    assert out.shape == (100, 1)
    assert jnp.allclose(out, ref, atol=1e-5, rtol=1e-5)

    # Exercise the multi-tile grid path (partial last tile, >1 grid step).
    x_big = jax.random.uniform(
        jax.random.PRNGKey(1), (2500, 1), jnp.float32, -10.0, 10.0
    )
    out_big = jax.block_until_ready(neural_network_forward(x_big, params_flat))
    ref_big = _reference_forward(x_big, *params)
    assert out_big.shape == (2500, 1)
    assert jnp.allclose(out_big, ref_big, atol=1e-5, rtol=1e-5)

    print("KERNEL_OK")
</pallas_src>

<mosaic_0001>
module attributes {stable_mosaic.version = 11 : i64} {
  func.func @_mlp_kernel(%arg0: i32, %arg1: memref<17xf32, #tpu.memory_space<smem>>, %arg2: memref<8x128xf32, #tpu.memory_space<vmem>>, %arg3: memref<8x128xf32, #tpu.memory_space<vmem>>) attributes {dimension_semantics = [#tpu.dimension_semantics<parallel>], iteration_bounds = array<i64: 1>, scalar_prefetch = 0 : i64, scratch_operands = 0 : i64, tpu.core_type = #tpu.core_type<tc>, window_params = [{transform_indices = @transform_0, window_bounds = array<i64: 17>}, {transform_indices = @transform_1, window_bounds = array<i64: 8, 128>}, {transform_indices = @transform_2, window_bounds = array<i64: 8, 128>}]} {
    %c0 = arith.constant 0 : index
    %c0_0 = arith.constant 0 : index
    %0 = vector.load %arg2[%c0, %c0_0] : memref<8x128xf32, #tpu.memory_space<vmem>>, vector<8x128xf32>
    %c0_1 = arith.constant 0 : index
    %1 = memref.load %arg1[%c0_1] : memref<17xf32, #tpu.memory_space<smem>>
    %2 = vector.broadcast %1 : f32 to vector<8x128xf32>
    %3 = arith.mulf %2, %0 : vector<8x128xf32>
    %c3 = arith.constant 3 : index
    %4 = memref.load %arg1[%c3] : memref<17xf32, #tpu.memory_space<smem>>
    %5 = vector.broadcast %4 : f32 to vector<8x128xf32>
    %6 = arith.addf %3, %5 : vector<8x128xf32>
    %c1 = arith.constant 1 : index
    %7 = memref.load %arg1[%c1] : memref<17xf32, #tpu.memory_space<smem>>
    %8 = vector.broadcast %7 : f32 to vector<8x128xf32>
    %9 = arith.mulf %8, %0 : vector<8x128xf32>
    %c4 = arith.constant 4 : index
    %10 = memref.load %arg1[%c4] : memref<17xf32, #tpu.memory_space<smem>>
    %11 = vector.broadcast %10 : f32 to vector<8x128xf32>
    %12 = arith.addf %9, %11 : vector<8x128xf32>
    %c2 = arith.constant 2 : index
    %13 = memref.load %arg1[%c2] : memref<17xf32, #tpu.memory_space<smem>>
    %14 = vector.broadcast %13 : f32 to vector<8x128xf32>
    %15 = arith.mulf %14, %0 : vector<8x128xf32>
    %c5 = arith.constant 5 : index
    %16 = memref.load %arg1[%c5] : memref<17xf32, #tpu.memory_space<smem>>
    %17 = vector.broadcast %16 : f32 to vector<8x128xf32>
    %18 = arith.addf %15, %17 : vector<8x128xf32>
    %19 = vector.shape_cast %6 : vector<8x128xf32> to vector<1x8x128xf32>
    %20 = vector.shape_cast %12 : vector<8x128xf32> to vector<1x8x128xf32>
    %21 = vector.shape_cast %18 : vector<8x128xf32> to vector<1x8x128xf32>
    %22 = tpu.concatenate %19, %20, %21 in 0 : vector<1x8x128xf32>, vector<1x8x128xf32>, vector<1x8x128xf32> -> vector<3x8x128xf32>
    %23 = arith.negf %22 : vector<3x8x128xf32>
    %24 = math.exp %23 : vector<3x8x128xf32>
    %cst = arith.constant 1.000000e+00 : f32
    %25 = vector.broadcast %cst : f32 to vector<3x8x128xf32>
    %26 = arith.addf %25, %24 : vector<3x8x128xf32>
    %27 = arith.divf %25, %26 : vector<3x8x128xf32>
    %c6 = arith.constant 6 : index
    %28 = memref.load %arg1[%c6] : memref<17xf32, #tpu.memory_space<smem>>
    %29 = vector.extract_strided_slice %27 {offsets = [0, 0, 0], sizes = [1, 8, 128], strides = [1, 1, 1]} : vector<3x8x128xf32> to vector<1x8x128xf32>
    %30 = vector.shape_cast %29 : vector<1x8x128xf32> to vector<8x128xf32>
    %31 = vector.broadcast %28 : f32 to vector<8x128xf32>
    %32 = arith.mulf %31, %30 : vector<8x128xf32>
    %c8 = arith.constant 8 : index
    %33 = memref.load %arg1[%c8] : memref<17xf32, #tpu.memory_space<smem>>
    %34 = vector.extract_strided_slice %27 {offsets = [1, 0, 0], sizes = [1, 8, 128], strides = [1, 1, 1]} : vector<3x8x128xf32> to vector<1x8x128xf32>
    %35 = vector.shape_cast %34 : vector<1x8x128xf32> to vector<8x128xf32>
    %36 = vector.broadcast %33 : f32 to vector<8x128xf32>
    %37 = arith.mulf %36, %35 : vector<8x128xf32>
    %38 = arith.addf %32, %37 : vector<8x128xf32>
    %c10 = arith.constant 10 : index
    %39 = memref.load %arg1[%c10] : memref<17xf32, #tpu.memory_space<smem>>
    %40 = vector.extract_strided_slice %27 {offsets = [2, 0, 0], sizes = [1, 8, 128], strides = [1, 1, 1]} : vector<3x8x128xf32> to vector<1x8x128xf32>
    %41 = vector.shape_cast %40 : vector<1x8x128xf32> to vector<8x128xf32>
    %42 = vector.broadcast %39 : f32 to vector<8x128xf32>
    %43 = arith.mulf %42, %41 : vector<8x128xf32>
    %44 = arith.addf %38, %43 : vector<8x128xf32>
    %c12 = arith.constant 12 : index
    %45 = memref.load %arg1[%c12] : memref<17xf32, #tpu.memory_space<smem>>
    %46 = vector.broadcast %45 : f32 to vector<8x128xf32>
    %47 = arith.addf %44, %46 : vector<8x128xf32>
    %c7 = arith.constant 7 : index
    %48 = memref.load %arg1[%c7] : memref<17xf32, #tpu.memory_space<smem>>
    %49 = vector.extract_strided_slice %27 {offsets = [0, 0, 0], sizes = [1, 8, 128], strides = [1, 1, 1]} : vector<3x8x128xf32> to vector<1x8x128xf32>
    %50 = vector.shape_cast %49 : vector<1x8x128xf32> to vector<8x128xf32>
    %51 = vector.broadcast %48 : f32 to vector<8x128xf32>
    %52 = arith.mulf %51, %50 : vector<8x128xf32>
    %c9 = arith.constant 9 : index
    %53 = memref.load %arg1[%c9] : memref<17xf32, #tpu.memory_space<smem>>
    %54 = vector.extract_strided_slice %27 {offsets = [1, 0, 0], sizes = [1, 8, 128], strides = [1, 1, 1]} : vector<3x8x128xf32> to vector<1x8x128xf32>
    %55 = vector.shape_cast %54 : vector<1x8x128xf32> to vector<8x128xf32>
    %56 = vector.broadcast %53 : f32 to vector<8x128xf32>
    %57 = arith.mulf %56, %55 : vector<8x128xf32>
    %58 = arith.addf %52, %57 : vector<8x128xf32>
    %c11 = arith.constant 11 : index
    %59 = memref.load %arg1[%c11] : memref<17xf32, #tpu.memory_space<smem>>
    %60 = vector.extract_strided_slice %27 {offsets = [2, 0, 0], sizes = [1, 8, 128], strides = [1, 1, 1]} : vector<3x8x128xf32> to vector<1x8x128xf32>
    %61 = vector.shape_cast %60 : vector<1x8x128xf32> to vector<8x128xf32>
    %62 = vector.broadcast %59 : f32 to vector<8x128xf32>
    %63 = arith.mulf %62, %61 : vector<8x128xf32>
    %64 = arith.addf %58, %63 : vector<8x128xf32>
    %c13 = arith.constant 13 : index
    %65 = memref.load %arg1[%c13] : memref<17xf32, #tpu.memory_space<smem>>
    %66 = vector.broadcast %65 : f32 to vector<8x128xf32>
    %67 = arith.addf %64, %66 : vector<8x128xf32>
    %68 = vector.shape_cast %47 : vector<8x128xf32> to vector<1x8x128xf32>
    %69 = vector.shape_cast %67 : vector<8x128xf32> to vector<1x8x128xf32>
    %70 = tpu.concatenate %68, %69 in 0 : vector<1x8x128xf32>, vector<1x8x128xf32> -> vector<2x8x128xf32>
    %71 = arith.negf %70 : vector<2x8x128xf32>
    %72 = math.exp %71 : vector<2x8x128xf32>
    %cst_2 = arith.constant 1.000000e+00 : f32
    %73 = vector.broadcast %cst_2 : f32 to vector<2x8x128xf32>
    %74 = arith.addf %73, %72 : vector<2x8x128xf32>
    %75 = arith.divf %73, %74 : vector<2x8x128xf32>
    %c14 = arith.constant 14 : index
    %76 = memref.load %arg1[%c14] : memref<17xf32, #tpu.memory_space<smem>>
    %77 = vector.extract_strided_slice %75 {offsets = [0, 0, 0], sizes = [1, 8, 128], strides = [1, 1, 1]} : vector<2x8x128xf32> to vector<1x8x128xf32>
    %78 = vector.shape_cast %77 : vector<1x8x128xf32> to vector<8x128xf32>
    %79 = vector.broadcast %76 : f32 to vector<8x128xf32>
    %80 = arith.mulf %79, %78 : vector<8x128xf32>
    %c15 = arith.constant 15 : index
    %81 = memref.load %arg1[%c15] : memref<17xf32, #tpu.memory_space<smem>>
    %82 = vector.extract_strided_slice %75 {offsets = [1, 0, 0], sizes = [1, 8, 128], strides = [1, 1, 1]} : vector<2x8x128xf32> to vector<1x8x128xf32>
    %83 = vector.shape_cast %82 : vector<1x8x128xf32> to vector<8x128xf32>
    %84 = vector.broadcast %81 : f32 to vector<8x128xf32>
    %85 = arith.mulf %84, %83 : vector<8x128xf32>
    %86 = arith.addf %80, %85 : vector<8x128xf32>
    %c16 = arith.constant 16 : index
    %87 = memref.load %arg1[%c16] : memref<17xf32, #tpu.memory_space<smem>>
    %88 = vector.broadcast %87 : f32 to vector<8x128xf32>
    %89 = arith.addf %86, %88 : vector<8x128xf32>
    %c0_3 = arith.constant 0 : index
    %c0_4 = arith.constant 0 : index
    %90 = vector.load %arg3[%c0_3, %c0_4] : memref<8x128xf32, #tpu.memory_space<vmem>>, vector<8x128xf32>
    tpu.vector_store %arg3[%c0_3, %c0_4], %89 {strides = array<i32>} : memref<8x128xf32, #tpu.memory_space<vmem>>, vector<8x128xf32>,
    return
  }
  func.func @transform_0(%arg0: i32) -> i32 {
    %c0_i32 = arith.constant 0 : i32
    %c0_i32_0 = arith.constant 0 : i32
    return %c0_i32 : i32
  }
  func.func @transform_1(%arg0: i32) -> (i32, i32) {
    %c0_i32 = arith.constant 0 : i32
    %c0_i32_0 = arith.constant 0 : i32
    return %arg0, %c0_i32 : i32, i32
  }
  func.func @transform_2(%arg0: i32) -> (i32, i32) {
    %c0_i32 = arith.constant 0 : i32
    %c0_i32_0 = arith.constant 0 : i32
    return %arg0, %c0_i32 : i32, i32
  }
}

</mosaic_0001>

<bundles_post_ra>
// kernel: neural_network_forward.1
= control target key start
LH: loop header
LB: loop body
LE: loop exit
PB: predicated region body
PF: predicated region fallthrough
CT: control target
= control target key end

     0   :  { %7 = vsyncpa [#allocation3], 0  ;;  %s198_s0 = inlined_call_operand.vmem [shape: f32[17], index: 0, kind: input, shape index: {}]   ;;  %s199_s1 = inlined_call_operand.vmem [shape: f32[8,128], index: 1, kind: input, shape index: {}]   ;;  %s200_s2 = inlined_call_operand.vmem [shape: f32[8,128], index: 2, kind: output, shape index: {}]  }
   0x1   :  { %s14_s11 = sshll.u32 %s198_s0, 4  ;;  %s15_s11 = int_to_ptr.vmem [resolvable:$true] %s14_s11 }
   0x2   :  { %s159_s12 = scalar_lea.vmem %s15_s11, 16  ;;  %p164_p1 = scmp.lt.s32.totalorder %s15_s11, %s15_s11 }
   0x3   :  { %p160_p0 = scmp.ne.s32.totalorder %s15_s11, %s159_s12  ;;  %p165_p2 = scmp.lt.s32.totalorder %s159_s12, %s159_s12 }
   0x5   :  { %p166_p3 = por %p165_p2, %p164_p1 }
   0x7   :  { %p167_p4 = pnand %p166_p3, %p160_p0 }
   0x9   :  { %170 = shalt.err (!%p167_p4)
}
   0xa   :  { %s173_s13 = smov [#allocation2]  }
   0xb   :  { %17 = dma.vmem_to_smem %s15_s11, 16, %s173_s13, [#allocation3]  }
   0xc   :  { %171 = dma.done.wait [#allocation3], 16  }
   0xd   :  { %172 = vsyncadd [#allocation3], 4294967280 }
   0xe   :  { %23 = sfence }
   0xf   :  { %s25_s14 = sld [smem:[#allocation2]]  ;;  %s117_s15 = sld [smem:[#allocation2 + $0x3]]  ;;  %v24_v0 = vld [vmem:[%s199_s1] sm:$0xff] }
  0x10   :  { %s118_s16 = sld [smem:[#allocation2 + $0x1]]  ;;  %s119_s17 = sld [smem:[#allocation2 + $0x4]] }
  0x11   :  { %s120_s18 = sld [smem:[#allocation2 + $0x2]]  ;;  %s121_s19 = sld [smem:[#allocation2 + $0x5]] }
  0x12   :  { %s125_s1 = sld [smem:[#allocation2 + $0x6]]  ;;  %s129_s21 = sld [smem:[#allocation2 + $0x7]] }
  0x13   :  { %s126_s22 = sld [smem:[#allocation2 + $0x8]]  ;;  %s130_s23 = sld [smem:[#allocation2 + $0x9]] }
  0x14   :  { %s127_s24 = sld [smem:[#allocation2 + $0xa]]  ;;  %s131_s25 = sld [smem:[#allocation2 + $0xb]] }
  0x15   :  { %v26_v1 = vstv %s25_s14  ;;  %v29_v2 = vstv %s117_s15  ;;  %s128_s26 = sld [smem:[#allocation2 + $0xc]]  ;;  %s132_s27 = sld [smem:[#allocation2 + $0xd]] }
  0x16   :  { %v27_v3 = vmul.f32 %v26_v1, %v24_v0  ;;  %v32_v4 = vstv %s118_s16  ;;  %v35_v5 = vstv %s119_s17  ;;  %s135_s28 = sld [smem:[#allocation2 + $0xe]]  ;;  %s136_s29 = sld [smem:[#allocation2 + $0xf]] }
  0x17   :  { %v33_v6 = vmul.f32 %v32_v4, %v24_v0  ;;  %v38_v7 = vstv %s120_s18  ;;  %v41_v8 = vstv %s121_s19  ;;  %s137_s30 = sld [smem:[#allocation2 + $0x10]] }
  0x18   :  { %v30_v9 = vadd.f32 %v29_v2, %v27_v3  ;;  %v39_v10 = vmul.f32 %v38_v7, %v24_v0  ;;  %v62_v22 = vstv %s125_s1  ;;  %v76_v23 = vstv %s129_s21 }
  0x19   :  { %v36_v11 = vadd.f32 %v35_v5, %v33_v6  ;;  %v65_v24 = vstv %s126_s22  ;;  %v79_v25 = vstv %s130_s23 }
  0x1a   :  { %v42_v12 = vadd.f32 %v41_v8, %v39_v10  ;;  %v122_v13 = vmul.f32 -1.442695, %v30_v9  ;;  %v69_v27 = vstv %s127_s24  ;;  %v83_v28 = vstv %s131_s25 }
  0x1b   :  { %v123_v14 = vmul.f32 -1.442695, %v36_v11  ;;  %v73_v39 = vstv %s128_s26  ;;  %v87_v40 = vstv %s132_s27 }
  0x1c   :  { %139 = vpow2.f32 %v122_v13  ;;  %v124_v15 = vmul.f32 -1.442695, %v42_v12  ;;  %v102_v51 = vstv %s135_s28  ;;  %v105_v52 = vstv %s136_s29 }
  0x1d   :  { %141 = vpow2.f32 %v123_v14  ;;  %v109_v57 = vstv %s137_s30 }
  0x1e   :  { %143 = vpow2.f32 %v124_v15 }
  0x26   :  { %v140_v16 = vpop.eup %139 }
  0x27   :  { %v142_v17 = vpop.eup %141  ;;  %v52_v18 = vadd.f32 1.0, %v140_v16 }
  0x28   :  { %v144_v19 = vpop.eup %143  ;;  %v53_v20 = vadd.f32 1.0, %v142_v17 }
  0x29   :  { %v54_v21 = vadd.f32 1.0, %v144_v19  ;;  %145 = vrcp.f32 %v52_v18 }
  0x2a   :  { %147 = vrcp.f32 %v53_v20 }
  0x2b   :  { %149 = vrcp.f32 %v54_v21 }
  0x33   :  { %v146_v26 = vpop.eup %145 }
  0x34   :  { %v148_v29 = vpop.eup %147  ;;  %v63_v30 = vmul.f32 %v146_v26, %v62_v22  ;;  %v77_v31 = vmul.f32 %v146_v26, %v76_v23 }
  0x35   :  { %v150_v32 = vpop.eup %149  ;;  %v66_v33 = vmul.f32 %v148_v29, %v65_v24  ;;  %v80_v34 = vmul.f32 %v148_v29, %v79_v25 }
  0x36   :  { %v70_v35 = vmul.f32 %v150_v32, %v69_v27  ;;  %v84_v36 = vmul.f32 %v150_v32, %v83_v28 }
  0x37   :  { %v67_v37 = vadd.f32 %v66_v33, %v63_v30  ;;  %v81_v38 = vadd.f32 %v80_v34, %v77_v31 }
  0x39   :  { %v71_v41 = vadd.f32 %v70_v35, %v67_v37  ;;  %v85_v42 = vadd.f32 %v84_v36, %v81_v38 }
  0x3b   :  { %v74_v43 = vadd.f32 %v73_v39, %v71_v41  ;;  %v88_v44 = vadd.f32 %v87_v40, %v85_v42 }
  0x3d   :  { %v133_v45 = vmul.f32 -1.442695, %v74_v43  ;;  %v134_v46 = vmul.f32 -1.442695, %v88_v44 }
  0x3f   :  { %151 = vpow2.f32 %v133_v45 }
  0x40   :  { %153 = vpow2.f32 %v134_v46 }
  0x49   :  { %v152_v47 = vpop.eup %151 }
  0x4a   :  { %v154_v48 = vpop.eup %153  ;;  %v95_v49 = vadd.f32 1.0, %v152_v47 }
  0x4b   :  { %v96_v50 = vadd.f32 1.0, %v154_v48 }
  0x4c   :  { %155 = vrcp.f32 %v95_v49 }
  0x4d   :  { %157 = vrcp.f32 %v96_v50 }
  0x56   :  { %v156_v53 = vpop.eup %155 }
  0x57   :  { %v158_v54 = vpop.eup %157  ;;  %v103_v55 = vmul.f32 %v156_v53, %v102_v51 }
  0x58   :  { %v106_v56 = vmul.f32 %v158_v54, %v105_v52 }
  0x5a   :  { %v107_v58 = vadd.f32 %v106_v56, %v103_v55 }
  0x5c   :  { %v110_v59 = vadd.f32 %v109_v57, %v107_v58 }
  0x5e   :  { %111 = vst [vmem:[%s200_s2] sm:$0xff] %v110_v59 }
  0x5f   :  { %116 = vsyncpa [#allocation3], 1 }

</bundles_post_ra>
